<compile_context>
chip_gen: v7x
topology: tpu7x:2x2x1
jax: 0.10.0
libtpu: 0.0.40
codegen_flags: <defaults>
</compile_context>

<pallas_src>
import functools
import math

import jax
import jax.numpy as jnp
from jax.experimental import pallas as pl
from jax.experimental.pallas import tpu as pltpu

_VMEM_LIMIT = 32 * 1024 * 1024  # safe on v5e/v6e (128 MiB) and v7x (64 MiB)
_MASK_VALUE = float(jnp.finfo(jnp.float32).min)  # matches torch.finfo(f32).min


def _pick_tile(dim, candidates):
    """Largest candidate that divides `dim`, else the full dim (always legal)."""
    for c in candidates:
        if dim % c == 0:
            return c
    return dim


def _head_group(num_heads, head_dim, target_cols):
    """Largest divisor g of num_heads with g*head_dim <= target_cols (>= 1)."""
    cap = max(1, min(num_heads, target_cols // max(1, head_dim)))
    for g in range(cap, 0, -1):
        if num_heads % g == 0:
            return g
    return 1


# --------------------------- q/k/v projection ---------------------------
# x (M, D) @ per-head weights (H, D, hd) -> q/k/v in head-major (H, M, hd).


def _qkv_proj_kernel(x_ref, wq_ref, bq_ref, wk_ref, bk_ref, wv_ref, bv_ref,
                     q_ref, k_ref, v_ref, acc_q, acc_k, acc_v, *, q_scale):
    kk = pl.program_id(2)

    @pl.when(kk == 0)
    def _():
        acc_q[...] = jnp.zeros_like(acc_q)
        acc_k[...] = jnp.zeros_like(acc_k)
        acc_v[...] = jnp.zeros_like(acc_v)

    x = x_ref[...]  # model dtype operands, f32 accumulation on the MXU
    for hh in range(wq_ref.shape[0]):  # static unrolled loop over head group
        acc_q[hh] += jnp.dot(x, wq_ref[hh], preferred_element_type=jnp.float32)
        acc_k[hh] += jnp.dot(x, wk_ref[hh], preferred_element_type=jnp.float32)
        acc_v[hh] += jnp.dot(x, wv_ref[hh], preferred_element_type=jnp.float32)

    @pl.when(kk == pl.num_programs(2) - 1)
    def _():
        q_ref[...] = ((acc_q[...] + bq_ref[...].astype(jnp.float32)) * q_scale
                      ).astype(q_ref.dtype)
        k_ref[...] = (acc_k[...] + bk_ref[...].astype(jnp.float32)).astype(k_ref.dtype)
        v_ref[...] = (acc_v[...] + bv_ref[...].astype(jnp.float32)).astype(v_ref.dtype)


def _qkv_projection(x, wq_h, bq_h, wk_h, bk_h, wv_h, bv_h, *, q_scale):
    M, K = x.shape
    H, _, hd = wq_h.shape
    tm = _pick_tile(M, (512, 256, 128, 64, 32, 16, 8))
    tkk = _pick_tile(K, (512, 256, 128))
    hpj = _head_group(H, hd, 256)  # heads per output-tile step (~256 lanes)

    x_spec = pl.BlockSpec((tm, tkk), lambda i, j, k: (i, k))
    w_spec = pl.BlockSpec((hpj, tkk, hd), lambda i, j, k: (j, k, 0))
    b_spec = pl.BlockSpec((hpj, 1, hd), lambda i, j, k: (j, 0, 0))
    o_spec = pl.BlockSpec((hpj, tm, hd), lambda i, j, k: (j, i, 0))
    out_sd = jax.ShapeDtypeStruct((H, M, hd), x.dtype)

    return pl.pallas_call(
        functools.partial(_qkv_proj_kernel, q_scale=q_scale),
        out_shape=(out_sd, out_sd, out_sd),
        grid_spec=pltpu.PrefetchScalarGridSpec(
            num_scalar_prefetch=0,
            grid=(M // tm, H // hpj, K // tkk),
            in_specs=[x_spec, w_spec, b_spec, w_spec, b_spec, w_spec, b_spec],
            out_specs=(o_spec, o_spec, o_spec),
            scratch_shapes=[pltpu.VMEM((hpj, tm, hd), jnp.float32)] * 3),
        compiler_params=pltpu.CompilerParams(
            dimension_semantics=("parallel", "parallel", "arbitrary"),
            vmem_limit_bytes=_VMEM_LIMIT),
    )(x, wq_h, bq_h, wk_h, bk_h, wv_h, bv_h)


# ----------------------------- flash attention ---------------------------
# q/k/v and output all in head-major (H, B*S, hd); grid (B, head-groups,
# q-tiles, k-tiles); online softmax with f32 scratch; causal handling.


def _flash_attn_kernel(q_ref, k_ref, v_ref, o_ref, m_sc, l_sc, acc_sc,
                       *, mask_value):
    qi = pl.program_id(2)
    ki = pl.program_id(3)
    tq = q_ref.shape[1]
    tk = k_ref.shape[1]

    @pl.when(ki == 0)
    def _():
        m_sc[...] = jnp.full_like(m_sc, -jnp.inf)
        l_sc[...] = jnp.zeros_like(l_sc)
        acc_sc[...] = jnp.zeros_like(acc_sc)

    q_start = qi * tq
    k_start = ki * tk

    def scores():
        # (hps, tq, hd) x (hps, tk, hd) -> (hps, tq, tk), f32 accumulation.
        return jnp.einsum("hqd,hkd->hqk", q_ref[...], k_ref[...],
                          preferred_element_type=jnp.float32)

    def online_update(s):
        m_prev = m_sc[...]
        m_new = jnp.maximum(m_prev, s.max(axis=-1, keepdims=True))
        alpha = jnp.exp(m_prev - m_new)
        p = jnp.exp(s - m_new)
        l_sc[...] = alpha * l_sc[...] + p.sum(axis=-1, keepdims=True)
        acc_sc[...] = alpha * acc_sc[...] + jnp.einsum(
            "hqk,hkd->hqd", p.astype(v_ref.dtype), v_ref[...],
            preferred_element_type=jnp.float32)
        m_sc[...] = m_new

    # K/V block fully below the causal diagonal: no mask needed.
    @pl.when(k_start + (tk - 1) <= q_start)
    def _():
        online_update(scores())

    # K/V block straddling the diagonal: build and apply the causal mask.
    @pl.when(jnp.logical_and(k_start <= q_start + (tq - 1),
                             k_start + (tk - 1) > q_start))
    def _():
        s = scores()
        row = q_start + jax.lax.broadcasted_iota(jnp.int32, s.shape, 1)
        col = k_start + jax.lax.broadcasted_iota(jnp.int32, s.shape, 2)
        online_update(jnp.where(row >= col, s, mask_value))

    @pl.when(ki == pl.num_programs(3) - 1)
    def _():
        o_ref[...] = (acc_sc[...] * pl.reciprocal(l_sc[...], approx=True)
                      ).astype(o_ref.dtype)


def _flash_attention(q, k, v, *, batch, seq):
    H, M, hd = q.shape
    assert M == batch * seq
    tq = _pick_tile(seq, (512, 256, 128, 64, 32, 16, 8))
    tk = tq
    hps = _head_group(H, hd, 256)  # heads per grid step
    nq = seq // tq
    nk = seq // tk

    def q_map(b, hg, qi, ki):
        return (hg, b * nq + qi, 0)

    def kv_map(b, hg, qi, ki):
        # Clamp above-diagonal K/V blocks to the last needed block: the block
        # index does not change, so Pallas issues no DMA for skipped steps.
        kmax = (qi * tq + (tq - 1)) // tk
        return (hg, b * nk + jnp.minimum(ki, kmax), 0)

    q_spec = pl.BlockSpec((hps, tq, hd), q_map)
    kv_spec = pl.BlockSpec((hps, tk, hd), kv_map)
    o_spec = pl.BlockSpec((hps, tq, hd), q_map)

    kernel = functools.partial(_flash_attn_kernel, mask_value=_MASK_VALUE)

    return pl.pallas_call(
        kernel,
        out_shape=jax.ShapeDtypeStruct((H, M, hd), q.dtype),
        grid_spec=pltpu.PrefetchScalarGridSpec(
            num_scalar_prefetch=0,
            grid=(batch, H // hps, nq, nk),
            in_specs=[q_spec, kv_spec, kv_spec],
            out_specs=o_spec,
            scratch_shapes=[pltpu.VMEM((hps, tq, 1), jnp.float32),
                            pltpu.VMEM((hps, tq, 1), jnp.float32),
                            pltpu.VMEM((hps, tq, hd), jnp.float32)]),
        compiler_params=pltpu.CompilerParams(
            dimension_semantics=("parallel", "parallel", "parallel", "arbitrary"),
            vmem_limit_bytes=_VMEM_LIMIT),
    )(q, k, v)


# ----------------------------- out projection ----------------------------
# ctx (H, M, hd) contracted over (head, hd) against wo (H, hd, D) -> (M, D);
# the head axis is the (arbitrary) contraction grid axis, so no merge-heads
# transpose is ever materialized.


def _out_proj_kernel(ctx_ref, w_ref, b_ref, o_ref, acc_ref):
    kk = pl.program_id(2)

    @pl.when(kk == 0)
    def _():
        acc_ref[...] = jnp.zeros_like(acc_ref)

    for hh in range(ctx_ref.shape[0]):  # static unrolled loop over head group
        acc_ref[...] += jnp.dot(ctx_ref[hh], w_ref[hh],
                                preferred_element_type=jnp.float32)

    @pl.when(kk == pl.num_programs(2) - 1)
    def _():
        o_ref[...] = (acc_ref[...] + b_ref[...].astype(jnp.float32)
                      ).astype(o_ref.dtype)


def _out_projection(ctx, wo_h, bo):
    H, M, hd = ctx.shape
    N = wo_h.shape[2]
    tm = _pick_tile(M, (512, 256, 128, 64, 32, 16, 8))
    tn = _pick_tile(N, (256, 128))
    hpk = _head_group(H, hd, 512)  # heads per contraction step (~512 K elems)

    return pl.pallas_call(
        _out_proj_kernel,
        out_shape=jax.ShapeDtypeStruct((M, N), ctx.dtype),
        grid_spec=pltpu.PrefetchScalarGridSpec(
            num_scalar_prefetch=0,
            grid=(M // tm, N // tn, H // hpk),
            in_specs=[pl.BlockSpec((hpk, tm, hd), lambda i, j, k: (k, i, 0)),
                      pl.BlockSpec((hpk, hd, tn), lambda i, j, k: (k, 0, j)),
                      pl.BlockSpec((1, tn), lambda i, j, k: (0, j))],
            out_specs=pl.BlockSpec((tm, tn), lambda i, j, k: (i, j)),
            scratch_shapes=[pltpu.VMEM((tm, tn), jnp.float32)]),
        compiler_params=pltpu.CompilerParams(
            dimension_semantics=("parallel", "parallel", "arbitrary"),
            vmem_limit_bytes=_VMEM_LIMIT),
    )(ctx, wo_h, bo)


# ------------------------------- top level --------------------------------


def fsgpt_moe_self_attention(hidden_states, params, *, num_heads):
    """Forward of FSGPTMoESelfAttention (eval / no-cache path)."""
    B, S, D = hidden_states.shape
    H = num_heads
    hd = D // H
    if hd * H != D:
        raise ValueError("embed_dim must be divisible by num_heads")
    if S % 8 != 0:
        # TODO(synk): pad the sequence to a multiple of 8 for odd lengths.
        raise ValueError("sequence length must be a multiple of 8")

    wq, bq, wk, bk, wv, bv, wo, bo = params
    M = B * S
    x2d = hidden_states.reshape(M, D)  # free reshape, no transpose

    # One-time weight re-layouts (small, D x D, done once wrapper-side):
    #  * projection weights -> (H, D, hd): per-head (in, out) slabs so the
    #    projection writes q/k/v directly head-major; no activation transposes.
    #  * out_proj weight -> (H, hd, D): heads become the contraction grid axis.
    def head_weight(w):
        return w.T.reshape(D, H, hd).transpose(1, 0, 2)

    def head_bias(b):
        return b.reshape(H, hd)[:, None, :]

    q_h, k_h, v_h = _qkv_projection(
        x2d, head_weight(wq), head_bias(bq), head_weight(wk), head_bias(bk),
        head_weight(wv), head_bias(bv), q_scale=1.0 / math.sqrt(hd))

    ctx_h = _flash_attention(q_h, k_h, v_h, batch=B, seq=S)

    out2d = _out_projection(ctx_h, wo.T.reshape(H, hd, D), bo.reshape(1, D))
    return out2d.reshape(B, S, D)


# ------------------------------- reference ---------------------------------


def _reference(hidden_states, params, *, num_heads):
    """Pure-JAX reference mirroring the PyTorch forward exactly."""
    wq, bq, wk, bk, wv, bv, wo, bo = params
    B, S, D = hidden_states.shape
    hd = D // num_heads
    x = hidden_states.astype(jnp.float32)

    q = (x @ wq.T + bq[0]) / math.sqrt(hd)
    k = x @ wk.T + bk[0]
    v = x @ wv.T + bv[0]

    def split(t):  # (B,S,D) -> (B,H,S,hd)
        return t.reshape(B, S, num_heads, hd).transpose(0, 2, 1, 3)

    q, k, v = split(q), split(k), split(v)
    scores = jnp.einsum("bhqd,bhkd->bhqk", q, k)
    causal = jnp.tril(jnp.ones((S, S), dtype=bool))
    scores = jnp.where(causal[None, None], scores, jnp.finfo(jnp.float32).min)
    probs = jax.nn.softmax(scores, axis=-1)
    ctx = jnp.einsum("bhqk,bhkd->bhqd", probs, v)
    ctx = ctx.transpose(0, 2, 1, 3).reshape(B, S, D)
    return ctx @ wo.T + bo[0]


if __name__ == "__main__":
    # Small config consistent with the module: hidden=32, heads=4, seq=8, batch=2.
    B, S, D, H = 2, 8, 32, 4

    key = jax.random.PRNGKey(0)
    keys = jax.random.split(key, 9)
    hidden_states = jax.random.normal(keys[0], (B, S, D), dtype=jnp.float32)

    def linear_params(kw, kb):
        w = jax.random.normal(kw, (D, D), dtype=jnp.float32) * (1.0 / math.sqrt(D))
        b = jax.random.normal(kb, (1, D), dtype=jnp.float32) * 0.02
        return w, b

    wq, bq = linear_params(keys[1], keys[2])
    wk, bk = linear_params(keys[3], keys[4])
    wv, bv = linear_params(keys[5], keys[6])
    wo, bo = linear_params(keys[7], keys[8])
    params = (wq, bq, wk, bk, wv, bv, wo, bo)

    out = fsgpt_moe_self_attention(hidden_states, params, num_heads=H)
    out = jax.block_until_ready(out)

    ref = _reference(hidden_states, params, num_heads=H)
    assert out.shape == (B, S, D)
    # Tolerance covers the approx-EUP reciprocal in the softmax finalize.
    assert jnp.allclose(out, ref, atol=5e-3, rtol=5e-3), "mismatch vs reference"

    print("KERNEL_OK")
</pallas_src>

<mosaic_0001>
module attributes {stable_mosaic.version = 11 : i64} {
  func.func @_qkv_proj_kernel(%arg0: i32, %arg1: i32, %arg2: i32, %arg3: memref<16x32xf32, #tpu.memory_space<vmem>>, %arg4: memref<4x32x8xf32, #tpu.memory_space<vmem>>, %arg5: memref<4x1x8xf32, #tpu.memory_space<vmem>>, %arg6: memref<4x32x8xf32, #tpu.memory_space<vmem>>, %arg7: memref<4x1x8xf32, #tpu.memory_space<vmem>>, %arg8: memref<4x32x8xf32, #tpu.memory_space<vmem>>, %arg9: memref<4x1x8xf32, #tpu.memory_space<vmem>>, %arg10: memref<4x16x8xf32, #tpu.memory_space<vmem>>, %arg11: memref<4x16x8xf32, #tpu.memory_space<vmem>>, %arg12: memref<4x16x8xf32, #tpu.memory_space<vmem>>, %arg13: memref<4x16x8xf32, #tpu.memory_space<vmem>>, %arg14: memref<4x16x8xf32, #tpu.memory_space<vmem>>, %arg15: memref<4x16x8xf32, #tpu.memory_space<vmem>>) attributes {dimension_semantics = [#tpu.dimension_semantics<parallel>, #tpu.dimension_semantics<parallel>, #tpu.dimension_semantics<arbitrary>], iteration_bounds = array<i64: 1, 1, 1>, scalar_prefetch = 0 : i64, scratch_operands = 3 : i64, tpu.core_type = #tpu.core_type<tc>, window_params = [{transform_indices = @transform_0, window_bounds = array<i64: 16, 32>}, {transform_indices = @transform_1, window_bounds = array<i64: 4, 32, 8>}, {transform_indices = @transform_2, window_bounds = array<i64: 4, 1, 8>}, {transform_indices = @transform_3, window_bounds = array<i64: 4, 32, 8>}, {transform_indices = @transform_4, window_bounds = array<i64: 4, 1, 8>}, {transform_indices = @transform_5, window_bounds = array<i64: 4, 32, 8>}, {transform_indices = @transform_6, window_bounds = array<i64: 4, 1, 8>}, {transform_indices = @transform_7, window_bounds = array<i64: 4, 16, 8>}, {transform_indices = @transform_8, window_bounds = array<i64: 4, 16, 8>}, {transform_indices = @transform_9, window_bounds = array<i64: 4, 16, 8>}]} {
    %c0_i32 = arith.constant 0 : i32
    %0 = arith.cmpi eq, %arg2, %c0_i32 : i32
    %1 = arith.extui %0 : i1 to i32
    %c0_i32_0 = arith.constant 0 : i32
    %2 = arith.cmpi ne, %1, %c0_i32_0 : i32
    scf.if %2 {
      %cst_120 = arith.constant 0.000000e+00 : f32
      %115 = vector.broadcast %cst_120 : f32 to vector<4x16x8xf32>
      %c0_121 = arith.constant 0 : index
      %c0_122 = arith.constant 0 : index
      %c0_123 = arith.constant 0 : index
      %116 = vector.load %arg13[%c0_121, %c0_122, %c0_123] : memref<4x16x8xf32, #tpu.memory_space<vmem>>, vector<4x16x8xf32>
      tpu.vector_store %arg13[%c0_121, %c0_122, %c0_123], %115 {strides = array<i32>} : memref<4x16x8xf32, #tpu.memory_space<vmem>>, vector<4x16x8xf32>,
      %cst_124 = arith.constant 0.000000e+00 : f32
      %117 = vector.broadcast %cst_124 : f32 to vector<4x16x8xf32>
      %c0_125 = arith.constant 0 : index
      %c0_126 = arith.constant 0 : index
      %c0_127 = arith.constant 0 : index
      %118 = vector.load %arg14[%c0_125, %c0_126, %c0_127] : memref<4x16x8xf32, #tpu.memory_space<vmem>>, vector<4x16x8xf32>
      tpu.vector_store %arg14[%c0_125, %c0_126, %c0_127], %117 {strides = array<i32>} : memref<4x16x8xf32, #tpu.memory_space<vmem>>, vector<4x16x8xf32>,
      %cst_128 = arith.constant 0.000000e+00 : f32
      %119 = vector.broadcast %cst_128 : f32 to vector<4x16x8xf32>
      %c0_129 = arith.constant 0 : index
      %c0_130 = arith.constant 0 : index
      %c0_131 = arith.constant 0 : index
      %120 = vector.load %arg15[%c0_129, %c0_130, %c0_131] : memref<4x16x8xf32, #tpu.memory_space<vmem>>, vector<4x16x8xf32>
      tpu.vector_store %arg15[%c0_129, %c0_130, %c0_131], %119 {strides = array<i32>} : memref<4x16x8xf32, #tpu.memory_space<vmem>>, vector<4x16x8xf32>,
    } else {
    }
    %c0 = arith.constant 0 : index
    %c0_1 = arith.constant 0 : index
    %3 = vector.load %arg3[%c0, %c0_1] : memref<16x32xf32, #tpu.memory_space<vmem>>, vector<16x32xf32>
    %c0_2 = arith.constant 0 : index
    %c0_3 = arith.constant 0 : index
    %c0_4 = arith.constant 0 : index
    %4 = vector.load %arg13[%c0_2, %c0_3, %c0_4] : memref<4x16x8xf32, #tpu.memory_space<vmem>>, vector<1x16x8xf32>
    %5 = vector.shape_cast %4 : vector<1x16x8xf32> to vector<16x8xf32>
    %c0_5 = arith.constant 0 : index
    %c0_6 = arith.constant 0 : index
    %c0_7 = arith.constant 0 : index
    %6 = vector.load %arg4[%c0_5, %c0_6, %c0_7] : memref<4x32x8xf32, #tpu.memory_space<vmem>>, vector<1x32x8xf32>
    %7 = vector.shape_cast %6 : vector<1x32x8xf32> to vector<32x8xf32>
    %cst = arith.constant dense<0.000000e+00> : vector<16x8xf32>
    %8 = tpu.matmul %3, %7, %cst {dimension_numbers = #tpu.dot_dimension_numbers<[1], [0], [0], [1], [0, 0, 1, 1], [], []>} : vector<16x32xf32>, vector<32x8xf32>, vector<16x8xf32> -> vector<16x8xf32>
    %9 = arith.addf %5, %8 : vector<16x8xf32>
    %c0_8 = arith.constant 0 : index
    %c0_9 = arith.constant 0 : index
    %c0_10 = arith.constant 0 : index
    %10 = vector.load %arg13[%c0_8, %c0_9, %c0_10] : memref<4x16x8xf32, #tpu.memory_space<vmem>>, vector<1x16x8xf32>
    %11 = vector.shape_cast %10 : vector<1x16x8xf32> to vector<16x8xf32>
    %12 = vector.shape_cast %9 : vector<16x8xf32> to vector<1x16x8xf32>
    tpu.vector_store %arg13[%c0_8, %c0_9, %c0_10], %12 {strides = array<i32>} : memref<4x16x8xf32, #tpu.memory_space<vmem>>, vector<1x16x8xf32>,
    %c0_11 = arith.constant 0 : index
    %c0_12 = arith.constant 0 : index
    %c0_13 = arith.constant 0 : index
    %13 = vector.load %arg14[%c0_11, %c0_12, %c0_13] : memref<4x16x8xf32, #tpu.memory_space<vmem>>, vector<1x16x8xf32>
    %14 = vector.shape_cast %13 : vector<1x16x8xf32> to vector<16x8xf32>
    %c0_14 = arith.constant 0 : index
    %c0_15 = arith.constant 0 : index
    %c0_16 = arith.constant 0 : index
    %15 = vector.load %arg6[%c0_14, %c0_15, %c0_16] : memref<4x32x8xf32, #tpu.memory_space<vmem>>, vector<1x32x8xf32>
    %16 = vector.shape_cast %15 : vector<1x32x8xf32> to vector<32x8xf32>
    %cst_17 = arith.constant dense<0.000000e+00> : vector<16x8xf32>
    %17 = tpu.matmul %3, %16, %cst_17 {dimension_numbers = #tpu.dot_dimension_numbers<[1], [0], [0], [1], [0, 0, 1, 1], [], []>} : vector<16x32xf32>, vector<32x8xf32>, vector<16x8xf32> -> vector<16x8xf32>
    %18 = arith.addf %14, %17 : vector<16x8xf32>
    %c0_18 = arith.constant 0 : index
    %c0_19 = arith.constant 0 : index
    %c0_20 = arith.constant 0 : index
    %19 = vector.load %arg14[%c0_18, %c0_19, %c0_20] : memref<4x16x8xf32, #tpu.memory_space<vmem>>, vector<1x16x8xf32>
    %20 = vector.shape_cast %19 : vector<1x16x8xf32> to vector<16x8xf32>
    %21 = vector.shape_cast %18 : vector<16x8xf32> to vector<1x16x8xf32>
    tpu.vector_store %arg14[%c0_18, %c0_19, %c0_20], %21 {strides = array<i32>} : memref<4x16x8xf32, #tpu.memory_space<vmem>>, vector<1x16x8xf32>,
    %c0_21 = arith.constant 0 : index
    %c0_22 = arith.constant 0 : index
    %c0_23 = arith.constant 0 : index
    %22 = vector.load %arg15[%c0_21, %c0_22, %c0_23] : memref<4x16x8xf32, #tpu.memory_space<vmem>>, vector<1x16x8xf32>
    %23 = vector.shape_cast %22 : vector<1x16x8xf32> to vector<16x8xf32>
    %c0_24 = arith.constant 0 : index
    %c0_25 = arith.constant 0 : index
    %c0_26 = arith.constant 0 : index
    %24 = vector.load %arg8[%c0_24, %c0_25, %c0_26] : memref<4x32x8xf32, #tpu.memory_space<vmem>>, vector<1x32x8xf32>
    %25 = vector.shape_cast %24 : vector<1x32x8xf32> to vector<32x8xf32>
    %cst_27 = arith.constant dense<0.000000e+00> : vector<16x8xf32>
    %26 = tpu.matmul %3, %25, %cst_27 {dimension_numbers = #tpu.dot_dimension_numbers<[1], [0], [0], [1], [0, 0, 1, 1], [], []>} : vector<16x32xf32>, vector<32x8xf32>, vector<16x8xf32> -> vector<16x8xf32>
    %27 = arith.addf %23, %26 : vector<16x8xf32>
    %c0_28 = arith.constant 0 : index
    %c0_29 = arith.constant 0 : index
    %c0_30 = arith.constant 0 : index
    %28 = vector.load %arg15[%c0_28, %c0_29, %c0_30] : memref<4x16x8xf32, #tpu.memory_space<vmem>>, vector<1x16x8xf32>
    %29 = vector.shape_cast %28 : vector<1x16x8xf32> to vector<16x8xf32>
    %30 = vector.shape_cast %27 : vector<16x8xf32> to vector<1x16x8xf32>
    tpu.vector_store %arg15[%c0_28, %c0_29, %c0_30], %30 {strides = array<i32>} : memref<4x16x8xf32, #tpu.memory_space<vmem>>, vector<1x16x8xf32>,
    %c1 = arith.constant 1 : index
    %c0_31 = arith.constant 0 : index
    %c0_32 = arith.constant 0 : index
    %31 = vector.load %arg13[%c1, %c0_31, %c0_32] : memref<4x16x8xf32, #tpu.memory_space<vmem>>, vector<1x16x8xf32>
    %32 = vector.shape_cast %31 : vector<1x16x8xf32> to vector<16x8xf32>
    %c1_33 = arith.constant 1 : index
    %c0_34 = arith.constant 0 : index
    %c0_35 = arith.constant 0 : index
    %33 = vector.load %arg4[%c1_33, %c0_34, %c0_35] : memref<4x32x8xf32, #tpu.memory_space<vmem>>, vector<1x32x8xf32>
    %34 = vector.shape_cast %33 : vector<1x32x8xf32> to vector<32x8xf32>
    %cst_36 = arith.constant dense<0.000000e+00> : vector<16x8xf32>
    %35 = tpu.matmul %3, %34, %cst_36 {dimension_numbers = #tpu.dot_dimension_numbers<[1], [0], [0], [1], [0, 0, 1, 1], [], []>} : vector<16x32xf32>, vector<32x8xf32>, vector<16x8xf32> -> vector<16x8xf32>
    %36 = arith.addf %32, %35 : vector<16x8xf32>
    %c1_37 = arith.constant 1 : index
    %c0_38 = arith.constant 0 : index
    %c0_39 = arith.constant 0 : index
    %37 = vector.load %arg13[%c1_37, %c0_38, %c0_39] : memref<4x16x8xf32, #tpu.memory_space<vmem>>, vector<1x16x8xf32>
    %38 = vector.shape_cast %37 : vector<1x16x8xf32> to vector<16x8xf32>
    %39 = vector.shape_cast %36 : vector<16x8xf32> to vector<1x16x8xf32>
    tpu.vector_store %arg13[%c1_37, %c0_38, %c0_39], %39 {strides = array<i32>} : memref<4x16x8xf32, #tpu.memory_space<vmem>>, vector<1x16x8xf32>,
    %c1_40 = arith.constant 1 : index
    %c0_41 = arith.constant 0 : index
    %c0_42 = arith.constant 0 : index
    %40 = vector.load %arg14[%c1_40, %c0_41, %c0_42] : memref<4x16x8xf32, #tpu.memory_space<vmem>>, vector<1x16x8xf32>
    %41 = vector.shape_cast %40 : vector<1x16x8xf32> to vector<16x8xf32>
    %c1_43 = arith.constant 1 : index
    %c0_44 = arith.constant 0 : index
    %c0_45 = arith.constant 0 : index
    %42 = vector.load %arg6[%c1_43, %c0_44, %c0_45] : memref<4x32x8xf32, #tpu.memory_space<vmem>>, vector<1x32x8xf32>
    %43 = vector.shape_cast %42 : vector<1x32x8xf32> to vector<32x8xf32>
    %cst_46 = arith.constant dense<0.000000e+00> : vector<16x8xf32>
    %44 = tpu.matmul %3, %43, %cst_46 {dimension_numbers = #tpu.dot_dimension_numbers<[1], [0], [0], [1], [0, 0, 1, 1], [], []>} : vector<16x32xf32>, vector<32x8xf32>, vector<16x8xf32> -> vector<16x8xf32>
    %45 = arith.addf %41, %44 : vector<16x8xf32>
    %c1_47 = arith.constant 1 : index
    %c0_48 = arith.constant 0 : index
    %c0_49 = arith.constant 0 : index
    %46 = vector.load %arg14[%c1_47, %c0_48, %c0_49] : memref<4x16x8xf32, #tpu.memory_space<vmem>>, vector<1x16x8xf32>
    %47 = vector.shape_cast %46 : vector<1x16x8xf32> to vector<16x8xf32>
    %48 = vector.shape_cast %45 : vector<16x8xf32> to vector<1x16x8xf32>
    tpu.vector_store %arg14[%c1_47, %c0_48, %c0_49], %48 {strides = array<i32>} : memref<4x16x8xf32, #tpu.memory_space<vmem>>, vector<1x16x8xf32>,
    %c1_50 = arith.constant 1 : index
    %c0_51 = arith.constant 0 : index
    %c0_52 = arith.constant 0 : index
    %49 = vector.load %arg15[%c1_50, %c0_51, %c0_52] : memref<4x16x8xf32, #tpu.memory_space<vmem>>, vector<1x16x8xf32>
    %50 = vector.shape_cast %49 : vector<1x16x8xf32> to vector<16x8xf32>
    %c1_53 = arith.constant 1 : index
    %c0_54 = arith.constant 0 : index
    %c0_55 = arith.constant 0 : index
    %51 = vector.load %arg8[%c1_53, %c0_54, %c0_55] : memref<4x32x8xf32, #tpu.memory_space<vmem>>, vector<1x32x8xf32>
    %52 = vector.shape_cast %51 : vector<1x32x8xf32> to vector<32x8xf32>
    %cst_56 = arith.constant dense<0.000000e+00> : vector<16x8xf32>
    %53 = tpu.matmul %3, %52, %cst_56 {dimension_numbers = #tpu.dot_dimension_numbers<[1], [0], [0], [1], [0, 0, 1, 1], [], []>} : vector<16x32xf32>, vector<32x8xf32>, vector<16x8xf32> -> vector<16x8xf32>
    %54 = arith.addf %50, %53 : vector<16x8xf32>
    %c1_57 = arith.constant 1 : index
    %c0_58 = arith.constant 0 : index
    %c0_59 = arith.constant 0 : index
    %55 = vector.load %arg15[%c1_57, %c0_58, %c0_59] : memref<4x16x8xf32, #tpu.memory_space<vmem>>, vector<1x16x8xf32>
    %56 = vector.shape_cast %55 : vector<1x16x8xf32> to vector<16x8xf32>
    %57 = vector.shape_cast %54 : vector<16x8xf32> to vector<1x16x8xf32>
    tpu.vector_store %arg15[%c1_57, %c0_58, %c0_59], %57 {strides = array<i32>} : memref<4x16x8xf32, #tpu.memory_space<vmem>>, vector<1x16x8xf32>,
    %c2 = arith.constant 2 : index
    %c0_60 = arith.constant 0 : index
    %c0_61 = arith.constant 0 : index
    %58 = vector.load %arg13[%c2, %c0_60, %c0_61] : memref<4x16x8xf32, #tpu.memory_space<vmem>>, vector<1x16x8xf32>
    %59 = vector.shape_cast %58 : vector<1x16x8xf32> to vector<16x8xf32>
    %c2_62 = arith.constant 2 : index
    %c0_63 = arith.constant 0 : index
    %c0_64 = arith.constant 0 : index
    %60 = vector.load %arg4[%c2_62, %c0_63, %c0_64] : memref<4x32x8xf32, #tpu.memory_space<vmem>>, vector<1x32x8xf32>
    %61 = vector.shape_cast %60 : vector<1x32x8xf32> to vector<32x8xf32>
    %cst_65 = arith.constant dense<0.000000e+00> : vector<16x8xf32>
    %62 = tpu.matmul %3, %61, %cst_65 {dimension_numbers = #tpu.dot_dimension_numbers<[1], [0], [0], [1], [0, 0, 1, 1], [], []>} : vector<16x32xf32>, vector<32x8xf32>, vector<16x8xf32> -> vector<16x8xf32>
    %63 = arith.addf %59, %62 : vector<16x8xf32>
    %c2_66 = arith.constant 2 : index
    %c0_67 = arith.constant 0 : index
    %c0_68 = arith.constant 0 : index
    %64 = vector.load %arg13[%c2_66, %c0_67, %c0_68] : memref<4x16x8xf32, #tpu.memory_space<vmem>>, vector<1x16x8xf32>
    %65 = vector.shape_cast %64 : vector<1x16x8xf32> to vector<16x8xf32>
    %66 = vector.shape_cast %63 : vector<16x8xf32> to vector<1x16x8xf32>
    tpu.vector_store %arg13[%c2_66, %c0_67, %c0_68], %66 {strides = array<i32>} : memref<4x16x8xf32, #tpu.memory_space<vmem>>, vector<1x16x8xf32>,
    %c2_69 = arith.constant 2 : index
    %c0_70 = arith.constant 0 : index
    %c0_71 = arith.constant 0 : index
    %67 = vector.load %arg14[%c2_69, %c0_70, %c0_71] : memref<4x16x8xf32, #tpu.memory_space<vmem>>, vector<1x16x8xf32>
    %68 = vector.shape_cast %67 : vector<1x16x8xf32> to vector<16x8xf32>
    %c2_72 = arith.constant 2 : index
    %c0_73 = arith.constant 0 : index
    %c0_74 = arith.constant 0 : index
    %69 = vector.load %arg6[%c2_72, %c0_73, %c0_74] : memref<4x32x8xf32, #tpu.memory_space<vmem>>, vector<1x32x8xf32>
    %70 = vector.shape_cast %69 : vector<1x32x8xf32> to vector<32x8xf32>
    %cst_75 = arith.constant dense<0.000000e+00> : vector<16x8xf32>
    %71 = tpu.matmul %3, %70, %cst_75 {dimension_numbers = #tpu.dot_dimension_numbers<[1], [0], [0], [1], [0, 0, 1, 1], [], []>} : vector<16x32xf32>, vector<32x8xf32>, vector<16x8xf32> -> vector<16x8xf32>
    %72 = arith.addf %68, %71 : vector<16x8xf32>
    %c2_76 = arith.constant 2 : index
    %c0_77 = arith.constant 0 : index
    %c0_78 = arith.constant 0 : index
    %73 = vector.load %arg14[%c2_76, %c0_77, %c0_78] : memref<4x16x8xf32, #tpu.memory_space<vmem>>, vector<1x16x8xf32>
    %74 = vector.shape_cast %73 : vector<1x16x8xf32> to vector<16x8xf32>
    %75 = vector.shape_cast %72 : vector<16x8xf32> to vector<1x16x8xf32>
    tpu.vector_store %arg14[%c2_76, %c0_77, %c0_78], %75 {strides = array<i32>} : memref<4x16x8xf32, #tpu.memory_space<vmem>>, vector<1x16x8xf32>,
    %c2_79 = arith.constant 2 : index
    %c0_80 = arith.constant 0 : index
    %c0_81 = arith.constant 0 : index
    %76 = vector.load %arg15[%c2_79, %c0_80, %c0_81] : memref<4x16x8xf32, #tpu.memory_space<vmem>>, vector<1x16x8xf32>
    %77 = vector.shape_cast %76 : vector<1x16x8xf32> to vector<16x8xf32>
    %c2_82 = arith.constant 2 : index
    %c0_83 = arith.constant 0 : index
    %c0_84 = arith.constant 0 : index
    %78 = vector.load %arg8[%c2_82, %c0_83, %c0_84] : memref<4x32x8xf32, #tpu.memory_space<vmem>>, vector<1x32x8xf32>
    %79 = vector.shape_cast %78 : vector<1x32x8xf32> to vector<32x8xf32>
    %cst_85 = arith.constant dense<0.000000e+00> : vector<16x8xf32>
    %80 = tpu.matmul %3, %79, %cst_85 {dimension_numbers = #tpu.dot_dimension_numbers<[1], [0], [0], [1], [0, 0, 1, 1], [], []>} : vector<16x32xf32>, vector<32x8xf32>, vector<16x8xf32> -> vector<16x8xf32>
    %81 = arith.addf %77, %80 : vector<16x8xf32>
    %c2_86 = arith.constant 2 : index
    %c0_87 = arith.constant 0 : index
    %c0_88 = arith.constant 0 : index
    %82 = vector.load %arg15[%c2_86, %c0_87, %c0_88] : memref<4x16x8xf32, #tpu.memory_space<vmem>>, vector<1x16x8xf32>
    %83 = vector.shape_cast %82 : vector<1x16x8xf32> to vector<16x8xf32>
    %84 = vector.shape_cast %81 : vector<16x8xf32> to vector<1x16x8xf32>
    tpu.vector_store %arg15[%c2_86, %c0_87, %c0_88], %84 {strides = array<i32>} : memref<4x16x8xf32, #tpu.memory_space<vmem>>, vector<1x16x8xf32>,
    %c3 = arith.constant 3 : index
    %c0_89 = arith.constant 0 : index
    %c0_90 = arith.constant 0 : index
    %85 = vector.load %arg13[%c3, %c0_89, %c0_90] : memref<4x16x8xf32, #tpu.memory_space<vmem>>, vector<1x16x8xf32>
    %86 = vector.shape_cast %85 : vector<1x16x8xf32> to vector<16x8xf32>
    %c3_91 = arith.constant 3 : index
    %c0_92 = arith.constant 0 : index
    %c0_93 = arith.constant 0 : index
    %87 = vector.load %arg4[%c3_91, %c0_92, %c0_93] : memref<4x32x8xf32, #tpu.memory_space<vmem>>, vector<1x32x8xf32>
    %88 = vector.shape_cast %87 : vector<1x32x8xf32> to vector<32x8xf32>
    %cst_94 = arith.constant dense<0.000000e+00> : vector<16x8xf32>
    %89 = tpu.matmul %3, %88, %cst_94 {dimension_numbers = #tpu.dot_dimension_numbers<[1], [0], [0], [1], [0, 0, 1, 1], [], []>} : vector<16x32xf32>, vector<32x8xf32>, vector<16x8xf32> -> vector<16x8xf32>
    %90 = arith.addf %86, %89 : vector<16x8xf32>
    %c3_95 = arith.constant 3 : index
    %c0_96 = arith.constant 0 : index
    %c0_97 = arith.constant 0 : index
    %91 = vector.load %arg13[%c3_95, %c0_96, %c0_97] : memref<4x16x8xf32, #tpu.memory_space<vmem>>, vector<1x16x8xf32>
    %92 = vector.shape_cast %91 : vector<1x16x8xf32> to vector<16x8xf32>
    %93 = vector.shape_cast %90 : vector<16x8xf32> to vector<1x16x8xf32>
    tpu.vector_store %arg13[%c3_95, %c0_96, %c0_97], %93 {strides = array<i32>} : memref<4x16x8xf32, #tpu.memory_space<vmem>>, vector<1x16x8xf32>,
    %c3_98 = arith.constant 3 : index
    %c0_99 = arith.constant 0 : index
    %c0_100 = arith.constant 0 : index
    %94 = vector.load %arg14[%c3_98, %c0_99, %c0_100] : memref<4x16x8xf32, #tpu.memory_space<vmem>>, vector<1x16x8xf32>
    %95 = vector.shape_cast %94 : vector<1x16x8xf32> to vector<16x8xf32>
    %c3_101 = arith.constant 3 : index
    %c0_102 = arith.constant 0 : index
    %c0_103 = arith.constant 0 : index
    %96 = vector.load %arg6[%c3_101, %c0_102, %c0_103] : memref<4x32x8xf32, #tpu.memory_space<vmem>>, vector<1x32x8xf32>
    %97 = vector.shape_cast %96 : vector<1x32x8xf32> to vector<32x8xf32>
    %cst_104 = arith.constant dense<0.000000e+00> : vector<16x8xf32>
    %98 = tpu.matmul %3, %97, %cst_104 {dimension_numbers = #tpu.dot_dimension_numbers<[1], [0], [0], [1], [0, 0, 1, 1], [], []>} : vector<16x32xf32>, vector<32x8xf32>, vector<16x8xf32> -> vector<16x8xf32>
    %99 = arith.addf %95, %98 : vector<16x8xf32>
    %c3_105 = arith.constant 3 : index
    %c0_106 = arith.constant 0 : index
    %c0_107 = arith.constant 0 : index
    %100 = vector.load %arg14[%c3_105, %c0_106, %c0_107] : memref<4x16x8xf32, #tpu.memory_space<vmem>>, vector<1x16x8xf32>
    %101 = vector.shape_cast %100 : vector<1x16x8xf32> to vector<16x8xf32>
    %102 = vector.shape_cast %99 : vector<16x8xf32> to vector<1x16x8xf32>
    tpu.vector_store %arg14[%c3_105, %c0_106, %c0_107], %102 {strides = array<i32>} : memref<4x16x8xf32, #tpu.memory_space<vmem>>, vector<1x16x8xf32>,
    %c3_108 = arith.constant 3 : index
    %c0_109 = arith.constant 0 : index
    %c0_110 = arith.constant 0 : index
    %103 = vector.load %arg15[%c3_108, %c0_109, %c0_110] : memref<4x16x8xf32, #tpu.memory_space<vmem>>, vector<1x16x8xf32>
    %104 = vector.shape_cast %103 : vector<1x16x8xf32> to vector<16x8xf32>
    %c3_111 = arith.constant 3 : index
    %c0_112 = arith.constant 0 : index
    %c0_113 = arith.constant 0 : index
    %105 = vector.load %arg8[%c3_111, %c0_112, %c0_113] : memref<4x32x8xf32, #tpu.memory_space<vmem>>, vector<1x32x8xf32>
    %106 = vector.shape_cast %105 : vector<1x32x8xf32> to vector<32x8xf32>
    %cst_114 = arith.constant dense<0.000000e+00> : vector<16x8xf32>
    %107 = tpu.matmul %3, %106, %cst_114 {dimension_numbers = #tpu.dot_dimension_numbers<[1], [0], [0], [1], [0, 0, 1, 1], [], []>} : vector<16x32xf32>, vector<32x8xf32>, vector<16x8xf32> -> vector<16x8xf32>
    %108 = arith.addf %104, %107 : vector<16x8xf32>
    %c3_115 = arith.constant 3 : index
    %c0_116 = arith.constant 0 : index
    %c0_117 = arith.constant 0 : index
    %109 = vector.load %arg15[%c3_115, %c0_116, %c0_117] : memref<4x16x8xf32, #tpu.memory_space<vmem>>, vector<1x16x8xf32>
    %110 = vector.shape_cast %109 : vector<1x16x8xf32> to vector<16x8xf32>
    %111 = vector.shape_cast %108 : vector<16x8xf32> to vector<1x16x8xf32>
    tpu.vector_store %arg15[%c3_115, %c0_116, %c0_117], %111 {strides = array<i32>} : memref<4x16x8xf32, #tpu.memory_space<vmem>>, vector<1x16x8xf32>,
    %c0_i32_118 = arith.constant 0 : i32
    %112 = arith.cmpi eq, %arg2, %c0_i32_118 : i32
    %113 = arith.extui %112 : i1 to i32
    %c0_i32_119 = arith.constant 0 : i32
    %114 = arith.cmpi ne, %113, %c0_i32_119 : i32
    scf.if %114 {
      %c0_120 = arith.constant 0 : index
      %c0_121 = arith.constant 0 : index
      %c0_122 = arith.constant 0 : index
      %115 = vector.load %arg13[%c0_120, %c0_121, %c0_122] : memref<4x16x8xf32, #tpu.memory_space<vmem>>, vector<4x16x8xf32>
      %c0_123 = arith.constant 0 : index
      %c0_124 = arith.constant 0 : index
      %c0_125 = arith.constant 0 : index
      %116 = vector.load %arg5[%c0_123, %c0_124, %c0_125] : memref<4x1x8xf32, #tpu.memory_space<vmem>>, vector<4x1x8xf32>
      %117 = vector.broadcast %116 : vector<4x1x8xf32> to vector<4x16x8xf32>
      %118 = arith.addf %115, %117 : vector<4x16x8xf32>
      %cst_126 = arith.constant 0.353553385 : f32
      %119 = vector.broadcast %cst_126 : f32 to vector<4x16x8xf32>
      %120 = arith.mulf %118, %119 : vector<4x16x8xf32>
      %c0_127 = arith.constant 0 : index
      %c0_128 = arith.constant 0 : index
      %c0_129 = arith.constant 0 : index
      %121 = vector.load %arg10[%c0_127, %c0_128, %c0_129] : memref<4x16x8xf32, #tpu.memory_space<vmem>>, vector<4x16x8xf32>
      tpu.vector_store %arg10[%c0_127, %c0_128, %c0_129], %120 {strides = array<i32>} : memref<4x16x8xf32, #tpu.memory_space<vmem>>, vector<4x16x8xf32>,
      %c0_130 = arith.constant 0 : index
      %c0_131 = arith.constant 0 : index
      %c0_132 = arith.constant 0 : index
      %122 = vector.load %arg14[%c0_130, %c0_131, %c0_132] : memref<4x16x8xf32, #tpu.memory_space<vmem>>, vector<4x16x8xf32>
      %c0_133 = arith.constant 0 : index
      %c0_134 = arith.constant 0 : index
      %c0_135 = arith.constant 0 : index
      %123 = vector.load %arg7[%c0_133, %c0_134, %c0_135] : memref<4x1x8xf32, #tpu.memory_space<vmem>>, vector<4x1x8xf32>
      %124 = vector.broadcast %123 : vector<4x1x8xf32> to vector<4x16x8xf32>
      %125 = arith.addf %122, %124 : vector<4x16x8xf32>
      %c0_136 = arith.constant 0 : index
      %c0_137 = arith.constant 0 : index
      %c0_138 = arith.constant 0 : index
      %126 = vector.load %arg11[%c0_136, %c0_137, %c0_138] : memref<4x16x8xf32, #tpu.memory_space<vmem>>, vector<4x16x8xf32>
      tpu.vector_store %arg11[%c0_136, %c0_137, %c0_138], %125 {strides = array<i32>} : memref<4x16x8xf32, #tpu.memory_space<vmem>>, vector<4x16x8xf32>,
      %c0_139 = arith.constant 0 : index
      %c0_140 = arith.constant 0 : index
      %c0_141 = arith.constant 0 : index
      %127 = vector.load %arg15[%c0_139, %c0_140, %c0_141] : memref<4x16x8xf32, #tpu.memory_space<vmem>>, vector<4x16x8xf32>
      %c0_142 = arith.constant 0 : index
      %c0_143 = arith.constant 0 : index
      %c0_144 = arith.constant 0 : index
      %128 = vector.load %arg9[%c0_142, %c0_143, %c0_144] : memref<4x1x8xf32, #tpu.memory_space<vmem>>, vector<4x1x8xf32>
      %129 = vector.broadcast %128 : vector<4x1x8xf32> to vector<4x16x8xf32>
      %130 = arith.addf %127, %129 : vector<4x16x8xf32>
      %c0_145 = arith.constant 0 : index
      %c0_146 = arith.constant 0 : index
      %c0_147 = arith.constant 0 : index
      %131 = vector.load %arg12[%c0_145, %c0_146, %c0_147] : memref<4x16x8xf32, #tpu.memory_space<vmem>>, vector<4x16x8xf32>
      tpu.vector_store %arg12[%c0_145, %c0_146, %c0_147], %130 {strides = array<i32>} : memref<4x16x8xf32, #tpu.memory_space<vmem>>, vector<4x16x8xf32>,
    } else {
    }
    return
  }
  func.func @transform_0(%arg0: i32, %arg1: i32, %arg2: i32) -> (i32, i32) {
    %c0_i32 = arith.constant 0 : i32
    return %arg0, %arg2 : i32, i32
  }
  func.func @transform_1(%arg0: i32, %arg1: i32, %arg2: i32) -> (i32, i32, i32) {
    %c0_i32 = arith.constant 0 : i32
    %c0_i32_0 = arith.constant 0 : i32
    return %arg1, %arg2, %c0_i32 : i32, i32, i32
  }
  func.func @transform_2(%arg0: i32, %arg1: i32, %arg2: i32) -> (i32, i32, i32) {
    %c0_i32 = arith.constant 0 : i32
    %c0_i32_0 = arith.constant 0 : i32
    %c0_i32_1 = arith.constant 0 : i32
    return %arg1, %c0_i32, %c0_i32_0 : i32, i32, i32
  }
  func.func @transform_3(%arg0: i32, %arg1: i32, %arg2: i32) -> (i32, i32, i32) {
    %c0_i32 = arith.constant 0 : i32
    %c0_i32_0 = arith.constant 0 : i32
    return %arg1, %arg2, %c0_i32 : i32, i32, i32
  }
  func.func @transform_4(%arg0: i32, %arg1: i32, %arg2: i32) -> (i32, i32, i32) {
    %c0_i32 = arith.constant 0 : i32
    %c0_i32_0 = arith.constant 0 : i32
    %c0_i32_1 = arith.constant 0 : i32
    return %arg1, %c0_i32, %c0_i32_0 : i32, i32, i32
  }
  func.func @transform_5(%arg0: i32, %arg1: i32, %arg2: i32) -> (i32, i32, i32) {
    %c0_i32 = arith.constant 0 : i32
    %c0_i32_0 = arith.constant 0 : i32
    return %arg1, %arg2, %c0_i32 : i32, i32, i32
  }
  func.func @transform_6(%arg0: i32, %arg1: i32, %arg2: i32) -> (i32, i32, i32) {
    %c0_i32 = arith.constant 0 : i32
    %c0_i32_0 = arith.constant 0 : i32
    %c0_i32_1 = arith.constant 0 : i32
    return %arg1, %c0_i32, %c0_i32_0 : i32, i32, i32
  }
  func.func @transform_7(%arg0: i32, %arg1: i32, %arg2: i32) -> (i32, i32, i32) {
    %c0_i32 = arith.constant 0 : i32
    %c0_i32_0 = arith.constant 0 : i32
    return %arg1, %arg0, %c0_i32 : i32, i32, i32
  }
  func.func @transform_8(%arg0: i32, %arg1: i32, %arg2: i32) -> (i32, i32, i32) {
    %c0_i32 = arith.constant 0 : i32
    %c0_i32_0 = arith.constant 0 : i32
    return %arg1, %arg0, %c0_i32 : i32, i32, i32
  }
  func.func @transform_9(%arg0: i32, %arg1: i32, %arg2: i32) -> (i32, i32, i32) {
    %c0_i32 = arith.constant 0 : i32
    %c0_i32_0 = arith.constant 0 : i32
    return %arg1, %arg0, %c0_i32 : i32, i32, i32
  }
}

</mosaic_0001>

<bundles_post_ra>
// kernel: tpu_custom_call.1
= control target key start
LH: loop header
LB: loop body
LE: loop exit
PB: predicated region body
PF: predicated region fallthrough
CT: control target
= control target key end

     0   :  { %vm33_vm0 = vcmask 64512   ;;  %vm66_vm1 = vcmask 261120   ;;  %v1658_v3 = vmov 0.0   ;;  %s2091_s1 = inlined_call_operand.vmem [shape: f32[4,32,8], index: 1, kind: input, shape index: {}]   ;;  %s2092_s3 = inlined_call_operand.vmem [shape: f32[4,32,8], index: 3, kind: input, shape index: {}]   ;;  %s2093_s0 = inlined_call_operand.vmem [shape: f32[16,32], index: 0, kind: input, shape index: {}]   ;;  %s2094_s5 = inlined_call_operand.vmem [shape: f32[4,32,8], index: 5, kind: input, shape index: {}]   ;;  %s2095_s2 = inlined_call_operand.vmem [shape: f32[4,1,8], index: 2, kind: input, shape index: {}]   ;;  %s2096_s4 = inlined_call_operand.vmem [shape: f32[4,1,8], index: 4, kind: input, shape index: {}]   ;;  %s2097_s8 = inlined_call_operand.vmem [shape: f32[4,16,8], index: 8, kind: output, shape index: {1}]   ;;  %s2098_s7 = inlined_call_operand.vmem [shape: f32[4,16,8], index: 7, kind: output, shape index: {0}]   ;;  %s2099_s6 = inlined_call_operand.vmem [shape: f32[4,1,8], index: 6, kind: input, shape index: {}]   ;;  %s2100_s9 = inlined_call_operand.vmem [shape: f32[4,16,8], index: 9, kind: output, shape index: {2}]  }
   0x1   :  { %v62_v0 = vld [vmem:[%s2091_s1] sm:$0xff]  ;;  %v63_v1 = vld [vmem:[%s2091_s1 + $0x8] sm:$0xff]  ;;  %35 = vst.msk [vmem:[#allocation2 + $0x8] sm:$0xff] %vm33_vm0, %v1658_v3  ;;  %34 = vst.msk [vmem:[#allocation2] sm:$0xff] %vm33_vm0, %v1658_v3 }
   0x2   :  { %v155_v2 = vld [vmem:[%s2092_s3] sm:$0xff]  ;;  %36 = vst.msk [vmem:[#allocation2 + $0x10] sm:$0xff] %vm33_vm0, %v1658_v3  ;;  %37 = vst.msk [vmem:[#allocation2 + $0x18] sm:$0xff] %vm33_vm0, %v1658_v3  ;;  %v1561_v4 = vpack.c.bf16 %v63_v1, %v62_v0  ;;  %v156_v5 = vld [vmem:[%s2092_s3 + $0x8] sm:$0xff] }
   0x3   :  { %38 = vst.msk [vmem:[#allocation2 + $0x20] sm:$0xff] %vm33_vm0, %v1658_v3  ;;  %39 = vst.msk [vmem:[#allocation2 + $0x28] sm:$0xff] %vm33_vm0, %v1658_v3  ;;  %v64_v6 = vld [vmem:[%s2091_s1 + $0x10] sm:$0xff]  ;;  %v65_v7 = vld [vmem:[%s2091_s1 + $0x18] sm:$0xff]  ;;  %v1569_v8 = vpack.c.bf16 %v156_v5, %v155_v2 }
   0x4   :  { %40 = vst.msk [vmem:[#allocation2 + $0x30] sm:$0xff] %vm33_vm0, %v1658_v3  ;;  %41 = vst.msk [vmem:[#allocation2 + $0x38] sm:$0xff] %vm33_vm0, %v1658_v3  ;;  %v1565_v9 = vpack.c.bf16 %v65_v7, %v64_v6  ;;  %v157_v10 = vld [vmem:[%s2092_s3 + $0x10] sm:$0xff]  ;;  %v158_v11 = vld [vmem:[%s2092_s3 + $0x18] sm:$0xff]  ;;  %1562 = vmatprep.subr.bf16.mxu0 %v1561_v4 }
   0x5   :  { %42 = vst.msk [vmem:[#allocation3] sm:$0xff] %vm33_vm0, %v1658_v3  ;;  %43 = vst.msk [vmem:[#allocation3 + $0x8] sm:$0xff] %vm33_vm0, %v1658_v3  ;;  %v1760_v12 = vld [vmem:[%s2093_s0] sm:$0xff]  ;;  %v1573_v13 = vpack.c.bf16 %v158_v11, %v157_v10  ;;  %v241_v15 = vld [vmem:[%s2094_s5 + $0x8] sm:$0xff]  ;;  %1570 = vmatprep.subr.bf16.mxu1 %v1569_v8  ;;  %1564 = vmatpush3.bf16.msra.mxu0 %v1561_v4 }
   0x6   :  { %44 = vst.msk [vmem:[#allocation3 + $0x10] sm:$0xff] %vm33_vm0, %v1658_v3  ;;  %45 = vst.msk [vmem:[#allocation3 + $0x18] sm:$0xff] %vm33_vm0, %v1658_v3  ;;  %1437 = vmatprep.mubr.msk.f32.mxu0 %vm66_vm1, %v1760_v12  ;;  %v240_v14 = vld [vmem:[%s2094_s5] sm:$0xff]  ;;  %v1292_v17 = vld [vmem:[%s2091_s1 + $0x28] sm:$0xff]  ;;  %1572 = vmatpush3.bf16.msra.mxu1 %v1569_v8 }
   0x7   :  { %46 = vst.msk [vmem:[#allocation3 + $0x20] sm:$0xff] %vm33_vm0, %v1658_v3  ;;  %47 = vst.msk [vmem:[#allocation3 + $0x28] sm:$0xff] %vm33_vm0, %v1658_v3  ;;  %v1291_v16 = vld [vmem:[%s2091_s1 + $0x20] sm:$0xff]  ;;  %1566 = vmatprep.subr.bf16.mxu0 %v1565_v9  ;;  %v1577_v18 = vpack.c.bf16 %v241_v15, %v240_v14  ;;  %1574 = vmatprep.subr.bf16.mxu1 %v1573_v13  ;;  %v242_v20 = vld [vmem:[%s2094_s5 + $0x10] sm:$0xff] }
   0x8   :  { %48 = vst.msk [vmem:[#allocation3 + $0x30] sm:$0xff] %vm33_vm0, %v1658_v3  ;;  %49 = vst.msk [vmem:[#allocation3 + $0x38] sm:$0xff] %vm33_vm0, %v1658_v3  ;;  %1448 = vmatprep.mubr.msk.f32.mxu1 %vm66_vm1, %v1760_v12  ;;  %v1585_v19 = vpack.c.bf16 %v1292_v17, %v1291_v16  ;;  %v243_v21 = vld [vmem:[%s2094_s5 + $0x18] sm:$0xff]  ;;  %v1293_v22 = vld [vmem:[%s2091_s1 + $0x30] sm:$0xff] }
   0x9   :  { %50 = vst.msk [vmem:[#allocation4] sm:$0xff] %vm33_vm0, %v1658_v3  ;;  %51 = vst.msk [vmem:[#allocation4 + $0x8] sm:$0xff] %vm33_vm0, %v1658_v3  ;;  %v1294_v23 = vld [vmem:[%s2091_s1 + $0x38] sm:$0xff]  ;;  %1568 = vmatpush3.bf16.msra.mxu0 %v1565_v9  ;;  %v1793_v24 = vld [vmem:[%s2093_s0 + $0x8] sm:$0xff]  ;;  %v1581_v25 = vpack.c.bf16 %v243_v21, %v242_v20 }
   0xa   :  { %52 = vst.msk [vmem:[#allocation4 + $0x10] sm:$0xff] %vm33_vm0, %v1658_v3  ;;  %53 = vst.msk [vmem:[#allocation4 + $0x18] sm:$0xff] %vm33_vm0, %v1658_v3  ;;  %1576 = vmatpush3.bf16.msra.mxu1 %v1573_v13  ;;  %1578 = vmatprep.subr.bf16.mxu0 %v1577_v18  ;;  %v1589_v26 = vpack.c.bf16 %v1294_v23, %v1293_v22  ;;  %v1297_v27 = vld [vmem:[%s2092_s3 + $0x20] sm:$0xff]  ;;  %v1298_v28 = vld [vmem:[%s2092_s3 + $0x28] sm:$0xff] }
   0xb   :  { %54 = vst.msk [vmem:[#allocation4 + $0x20] sm:$0xff] %vm33_vm0, %v1658_v3  ;;  %55 = vst.msk [vmem:[#allocation4 + $0x28] sm:$0xff] %vm33_vm0, %v1658_v3  ;;  %1586 = vmatprep.subr.bf16.mxu1 %v1585_v19  ;;  %v1303_v29 = vld [vmem:[%s2094_s5 + $0x20] sm:$0xff]  ;;  %v1304_v30 = vld [vmem:[%s2094_s5 + $0x28] sm:$0xff]  ;;  %v1593_v31 = vpack.c.bf16 %v1298_v28, %v1297_v27 }
   0xc   :  { %56 = vst.msk [vmem:[#allocation4 + $0x30] sm:$0xff] %vm33_vm0, %v1658_v3  ;;  %57 = vst.msk [vmem:[#allocation4 + $0x38] sm:$0xff] %vm33_vm0, %v1658_v3  ;;  %1438 = vmatmul.mubr.msk.f32.vlgmr.msra.gmra.mrb[0].mxu0 %vm66_vm1, %v1793_v24  ;;  %v1601_v32 = vpack.c.bf16 %v1304_v30, %v1303_v29  ;;  %v1299_v33 = vld [vmem:[%s2092_s3 + $0x30] sm:$0xff]  ;;  %v1300_v34 = vld [vmem:[%s2092_s3 + $0x38] sm:$0xff] }
   0xd   :  { %1449 = vmatmul.mubr.msk.f32.vlgmr.msra.gmra.mrb[0].mxu1 %vm66_vm1, %v1793_v24  ;;  %1580 = vmatpush3.bf16.msra.mxu0 %v1577_v18  ;;  %v1305_v35 = vld [vmem:[%s2094_s5 + $0x30] sm:$0xff]  ;;  %v1306_v36 = vld [vmem:[%s2094_s5 + $0x38] sm:$0xff]  ;;  %v1597_v37 = vpack.c.bf16 %v1300_v34, %v1299_v33  ;;  %v1309_v39 = vld [vmem:[%s2091_s1 + $0x40] sm:$0xff] }
   0xe   :  { %1588 = vmatpush3.bf16.msra.mxu1 %v1585_v19  ;;  %1582 = vmatprep.subr.bf16.mxu0 %v1581_v25  ;;  %v1605_v38 = vpack.c.bf16 %v1306_v36, %v1305_v35  ;;  %v1310_v40 = vld [vmem:[%s2091_s1 + $0x48] sm:$0xff]  ;;  %v1315_v41 = vld [vmem:[%s2092_s3 + $0x40] sm:$0xff]  ;;  %v1311_v45 = vld [vmem:[%s2091_s1 + $0x50] sm:$0xff] }
   0xf   :  { %1590 = vmatprep.subr.bf16.mxu1 %v1589_v26  ;;  %1459 = vmatprep.mubr.msk.f32.mxu0 %vm66_vm1, %v1760_v12  ;;  %v1316_v42 = vld [vmem:[%s2092_s3 + $0x48] sm:$0xff]  ;;  %v1609_v43 = vpack.c.bf16 %v1310_v40, %v1309_v39  ;;  %v1312_v46 = vld [vmem:[%s2091_s1 + $0x58] sm:$0xff]  ;;  %v1317_v47 = vld [vmem:[%s2092_s3 + $0x50] sm:$0xff] }
  0x10   :  { %1470 = vmatprep.mubr.msk.f32.mxu1 %vm66_vm1, %v1760_v12  ;;  %v1617_v44 = vpack.c.bf16 %v1316_v42, %v1315_v41  ;;  %v1318_v48 = vld [vmem:[%s2092_s3 + $0x58] sm:$0xff]  ;;  %v1613_v49 = vpack.c.bf16 %v1312_v46, %v1311_v45  ;;  %v1321_v51 = vld [vmem:[%s2094_s5 + $0x40] sm:$0xff]  ;;  %v1322_v52 = vld [vmem:[%s2094_s5 + $0x48] sm:$0xff] }
  0x11   :  { %1584 = vmatpush3.bf16.msra.mxu0 %v1581_v25  ;;  %v1621_v50 = vpack.c.bf16 %v1318_v48, %v1317_v47  ;;  %v1327_v53 = vld [vmem:[%s2091_s1 + $0x60] sm:$0xff]  ;;  %v1328_v54 = vld [vmem:[%s2091_s1 + $0x68] sm:$0xff]  ;;  %v1625_v55 = vpack.c.bf16 %v1322_v52, %v1321_v51  ;;  %v1323_v57 = vld [vmem:[%s2094_s5 + $0x50] sm:$0xff] }
  0x12   :  { %1592 = vmatpush3.bf16.msra.mxu1 %v1589_v26  ;;  %1594 = vmatprep.subr.bf16.mxu0 %v1593_v31  ;;  %v1633_v56 = vpack.c.bf16 %v1328_v54, %v1327_v53  ;;  %v1324_v58 = vld [vmem:[%s2094_s5 + $0x58] sm:$0xff]  ;;  %v1329_v59 = vld [vmem:[%s2091_s1 + $0x70] sm:$0xff]  ;;  %v1333_v63 = vld [vmem:[%s2092_s3 + $0x60] sm:$0xff] }
  0x13   :  { %1602 = vmatprep.subr.bf16.mxu1 %v1601_v32  ;;  %v1330_v60 = vld [vmem:[%s2091_s1 + $0x78] sm:$0xff]  ;;  %v1629_v61 = vpack.c.bf16 %v1324_v58, %v1323_v57  ;;  %v1334_v0 = vld [vmem:[%s2092_s3 + $0x68] sm:$0xff]  ;;  %v1339_v1 = vld [vmem:[%s2094_s5 + $0x60] sm:$0xff] }
  0x14   :  { %1460 = vmatmul.mubr.msk.f32.vlgmr.msra.gmra.mrb[2].mxu0 %vm66_vm1, %v1793_v24  ;;  %v1637_v62 = vpack.c.bf16 %v1330_v60, %v1329_v59  ;;  %v1340_v2 = vld [vmem:[%s2094_s5 + $0x68] sm:$0xff]  ;;  %v1641_v3 = vpack.c.bf16 %v1334_v0, %v1333_v63  ;;  %v1335_v5 = vld [vmem:[%s2092_s3 + $0x70] sm:$0xff]  ;;  %v1336_v6 = vld [vmem:[%s2092_s3 + $0x78] sm:$0xff] }
  0x15   :  { %1471 = vmatmul.mubr.msk.f32.vlgmr.msra.gmra.mrb[2].mxu1 %vm66_vm1, %v1793_v24  ;;  %1596 = vmatpush3.bf16.msra.mxu0 %v1593_v31  ;;  %v1649_v4 = vpack.c.bf16 %v1340_v2, %v1339_v1  ;;  %v1341_v7 = vld [vmem:[%s2094_s5 + $0x70] sm:$0xff]  ;;  %v1342_v8 = vld [vmem:[%s2094_s5 + $0x78] sm:$0xff]  ;;  %v1645_v9 = vpack.c.bf16 %v1336_v6, %v1335_v5  ;;  %v61_v11 = vld [vmem:[#allocation2 + $0x8] sm:$0xff] }
  0x16   :  { %1604 = vmatpush3.bf16.msra.mxu1 %v1601_v32  ;;  %1598 = vmatprep.subr.bf16.mxu0 %v1597_v37  ;;  %v1653_v10 = vpack.c.bf16 %v1342_v8, %v1341_v7  ;;  %v154_v13 = vld [vmem:[#allocation3 + $0x8] sm:$0xff]  ;;  %v60_v14 = vld [vmem:[#allocation2] sm:$0xff]  ;;  %v324_v28 = vld [vmem:[#allocation2 + $0x10] sm:$0xff] }
  0x17   :  { %1606 = vmatprep.subr.bf16.mxu1 %v1605_v38  ;;  %1481 = vmatprep.mubr.msk.f32.mxu0 %vm66_vm1, %v1760_v12  ;;  %v153_v16 = vld [vmem:[#allocation3] sm:$0xff]  ;;  %v239_v23 = vld [vmem:[#allocation4 + $0x8] sm:$0xff]  ;;  %v412_v47 = vld [vmem:[#allocation3 + $0x18] sm:$0xff] }
  0x18   :  { %1492 = vmatprep.mubr.msk.f32.mxu1 %vm66_vm1, %v1760_v12  ;;  %v238_v25 = vld [vmem:[#allocation4] sm:$0xff]  ;;  %v499_v48 = vld [vmem:[#allocation4 + $0x18] sm:$0xff]  ;;  %v498_v52 = vld [vmem:[#allocation4 + $0x10] sm:$0xff] }
  0x19   :  { %1600 = vmatpush3.bf16.msra.mxu0 %v1597_v37  ;;  %v1345_v26 = vld [vmem:[%s2095_s2] ss:$0 sm:$0xff]  ;;  %v1346_v53 = vld [vmem:[%s2095_s2 + $0x1] ss:$0 sm:$0xff]  ;;  %v586_v6 = vld [vmem:[#allocation2 + $0x28] sm:$0xff] }
  0x1a   :  { %1608 = vmatpush3.bf16.msra.mxu1 %v1605_v38  ;;  %1610 = vmatprep.subr.bf16.mxu0 %v1609_v43  ;;  %v1349_v29 = vld [vmem:[%s2096_s4] ss:$0 sm:$0xff]  ;;  %v673_v8 = vld [vmem:[#allocation3 + $0x28] sm:$0xff] }
  0x1b   :  { %1618 = vmatprep.subr.bf16.mxu1 %v1617_v44 }
  0x1c   :  { %1482 = vmatmul.mubr.msk.f32.vlgmr.msra.gmra.mrb[4].mxu0 %vm66_vm1, %v1793_v24 }
  0x1d   :  { %1493 = vmatmul.mubr.msk.f32.vlgmr.msra.gmra.mrb[4].mxu1 %vm66_vm1, %v1793_v24  ;;  %1612 = vmatpush3.bf16.msra.mxu0 %v1609_v43 }
  0x1e   :  { %1620 = vmatpush3.bf16.msra.mxu1 %v1617_v44  ;;  %1614 = vmatprep.subr.bf16.mxu0 %v1613_v49 }
  0x1f   :  { %1622 = vmatprep.subr.bf16.mxu1 %v1621_v50  ;;  %1503 = vmatprep.mubr.msk.f32.mxu0 %vm66_vm1, %v1760_v12 }
  0x20   :  { %1514 = vmatprep.mubr.msk.f32.mxu1 %vm66_vm1, %v1760_v12 }
  0x21   :  { %1616 = vmatpush3.bf16.msra.mxu0 %v1613_v49  ;;  %v411_v49 = vld [vmem:[#allocation3 + $0x10] sm:$0xff] }
  0x22   :  { %1624 = vmatpush3.bf16.msra.mxu1 %v1621_v50  ;;  %1626 = vmatprep.subr.bf16.mxu0 %v1625_v55  ;;  %v1353_v50 = vld [vmem:[%s2099_s6] ss:$0 sm:$0xff] }
  0x23   :  { %1634 = vmatprep.subr.bf16.mxu1 %v1633_v56 }
  0x24   :  { %1504 = vmatmul.mubr.msk.f32.vlgmr.msra.gmra.mrb[6].mxu0 %vm66_vm1, %v1793_v24 }
  0x25   :  { %1515 = vmatmul.mubr.msk.f32.vlgmr.msra.gmra.mrb[6].mxu1 %vm66_vm1, %v1793_v24  ;;  %1628 = vmatpush3.bf16.msra.mxu0 %v1625_v55 }
  0x26   :  { %1636 = vmatpush3.bf16.msra.mxu1 %v1633_v56  ;;  %1630 = vmatprep.subr.bf16.mxu0 %v1629_v61 }
  0x27   :  { %1638 = vmatprep.subr.bf16.mxu1 %v1637_v62  ;;  %1525 = vmatprep.mubr.msk.f32.mxu0 %vm66_vm1, %v1760_v12 }
  0x28   :  { %1536 = vmatprep.mubr.msk.f32.mxu1 %vm66_vm1, %v1760_v12 }
  0x29   :  { %1632 = vmatpush3.bf16.msra.mxu0 %v1629_v61 }
  0x2a   :  { %1640 = vmatpush3.bf16.msra.mxu1 %v1637_v62  ;;  %1642 = vmatprep.subr.bf16.mxu0 %v1641_v3 }
  0x2b   :  { %1650 = vmatprep.subr.bf16.mxu1 %v1649_v4 }
  0x2c   :  { %1526 = vmatmul.mubr.msk.f32.vlgmr.msra.gmra.mrb[8].mxu0 %vm66_vm1, %v1793_v24 }
  0x2d   :  { %1537 = vmatmul.mubr.msk.f32.vlgmr.msra.gmra.mrb[8].mxu1 %vm66_vm1, %v1793_v24  ;;  %1644 = vmatpush3.bf16.msra.mxu0 %v1641_v3 }
  0x2e   :  { %1652 = vmatpush3.bf16.msra.mxu1 %v1649_v4  ;;  %1646 = vmatprep.subr.bf16.mxu0 %v1645_v9 }
  0x2f   :  { %1654 = vmatprep.subr.bf16.mxu1 %v1653_v10  ;;  %1547 = vmatprep.mubr.msk.f32.mxu0 %vm66_vm1, %v1760_v12 }
  0x30   :  { %1558 = vmatprep.mubr.msk.f32.mxu1 %vm66_vm1, %v1760_v12 }
  0x31   :  { %1648 = vmatpush3.bf16.msra.mxu0 %v1645_v9  ;;  %v585_v9 = vld [vmem:[#allocation2 + $0x20] sm:$0xff] }
  0x32   :  { %1656 = vmatpush3.bf16.msra.mxu1 %v1653_v10  ;;  %v1350_v10 = vld [vmem:[%s2096_s4 + $0x1] ss:$0 sm:$0xff] }
  0x34   :  { %1548 = vmatmul.mubr.msk.f32.vlgmr.msra.gmra.mrb[10].mxu0 %vm66_vm1, %v1793_v24 }
  0x35   :  { %1559 = vmatmul.mubr.msk.f32.vlgmr.msra.gmra.mrb[10].mxu1 %vm66_vm1, %v1793_v24  ;;  %v325_v24 = vld [vmem:[#allocation2 + $0x18] sm:$0xff] }
  0xdf   :  { %v1439_v15 = vpop.f32.mrb[0].mxu0 }
  0xe0   :  { %v149_v17 = vadd.f32 %v1439_v15, %v61_v11  ;;  %v1450_v18 = vpop.f32.mrb[0].mxu1  ;;  %v139_v19 = vpop.f32.mrb[1].mxu0 }
  0xe1   :  { %v235_v20 = vadd.f32 %v1450_v18, %v154_v13  ;;  %v148_v21 = vadd.f32 %v139_v19, %v60_v14  ;;  %v225_v22 = vpop.f32.mrb[1].mxu1  ;;  %v672_v13 = vld [vmem:[#allocation3 + $0x20] sm:$0xff] }
  0xe2   :  { %152 = vst.msk [vmem:[#allocation2 + $0x8] sm:$0xff] %vm33_vm0, %v149_v17  ;;  %v234_v12 = vadd.f32 %v225_v22, %v153_v16  ;;  %v1354_v14 = vld [vmem:[%s2099_s6 + $0x1] ss:$0 sm:$0xff] }
  0xe3   :  { %237 = vst.msk [vmem:[#allocation3 + $0x8] sm:$0xff] %vm33_vm0, %v235_v20  ;;  %151 = vst.msk [vmem:[#allocation2] sm:$0xff] %vm33_vm0, %v148_v21 }
  0xe4   :  { %236 = vst.msk [vmem:[#allocation3] sm:$0xff] %vm33_vm0, %v234_v12 }
  0xe7   :  { %v1461_v27 = vpop.f32.mrb[2].mxu0 }
  0xe8   :  { %v320_v30 = vadd.f32 %v1461_v27, %v239_v23  ;;  %v1472_v31 = vpop.f32.mrb[2].mxu1  ;;  %v310_v32 = vpop.f32.mrb[3].mxu0 }
  0xe9   :  { %v1110_v33 = vld [vmem:[#allocation2 + $0x8] sm:$0xff]  ;;  %v407_v34 = vadd.f32 %v1472_v31, %v325_v24  ;;  %v319_v35 = vadd.f32 %v310_v32, %v238_v25  ;;  %v397_v36 = vpop.f32.mrb[3].mxu1  ;;  %v759_v31 = vld [vmem:[#allocation4 + $0x20] sm:$0xff] }
  0xea   :  { %v1146_v37 = vadd.f32 %v1345_v26, %v1110_v33  ;;  %v1170_v38 = vld [vmem:[#allocation3 + $0x8] sm:$0xff]  ;;  %v1109_v39 = vld [vmem:[#allocation2] sm:$0xff]  ;;  %322 = vst.msk [vmem:[#allocation4 + $0x8] sm:$0xff] %vm33_vm0, %v320_v30  ;;  %v406_v40 = vadd.f32 %v397_v36, %v324_v28  ;;  %v847_v30 = vld [vmem:[#allocation2 + $0x38] sm:$0xff] }
  0xeb   :  { %v1206_v41 = vadd.f32 %v1349_v29, %v1170_v38  ;;  %v1145_v42 = vadd.f32 %v1345_v26, %v1109_v39  ;;  %v1169_v43 = vld [vmem:[#allocation3] sm:$0xff]  ;;  %409 = vst.msk [vmem:[#allocation2 + $0x18] sm:$0xff] %vm33_vm0, %v407_v34  ;;  %321 = vst.msk [vmem:[#allocation4] sm:$0xff] %vm33_vm0, %v319_v35  ;;  %v846_v34 = vld [vmem:[#allocation2 + $0x30] sm:$0xff] }
  0xec   :  { %v1154_v44 = vmul.f32 0.35355338, %v1146_v37  ;;  %v1205_v45 = vadd.f32 %v1349_v29, %v1169_v43  ;;  %408 = vst.msk [vmem:[#allocation2 + $0x10] sm:$0xff] %vm33_vm0, %v406_v40  ;;  %v760_v29 = vld [vmem:[#allocation4 + $0x28] sm:$0xff]  ;;  %v1347_v32 = vld [vmem:[%s2095_s2 + $0x2] ss:$0 sm:$0xff] }
  0xed   :  { %1214 = vst.msk [vmem:[%s2097_s8 + $0x8] sm:$0xff] %vm33_vm0, %v1206_v41  ;;  %v1153_v46 = vmul.f32 0.35355338, %v1145_v42  ;;  %v1351_v35 = vld [vmem:[%s2096_s4 + $0x2] ss:$0 sm:$0xff] }
  0xee   :  { %1162 = vst.msk [vmem:[%s2098_s7 + $0x8] sm:$0xff] %vm33_vm0, %v1154_v44  ;;  %1213 = vst.msk [vmem:[%s2097_s8] sm:$0xff] %vm33_vm0, %v1205_v45 }
  0xef   :  { %1161 = vst.msk [vmem:[%s2098_s7] sm:$0xff] %vm33_vm0, %v1153_v46  ;;  %v1483_v51 = vpop.f32.mrb[4].mxu0 }
  0xf0   :  { %v494_v54 = vadd.f32 %v1483_v51, %v412_v47  ;;  %v1494_v55 = vpop.f32.mrb[4].mxu1  ;;  %v484_v56 = vpop.f32.mrb[5].mxu0 }
  0xf1   :  { %v1222_v57 = vld [vmem:[#allocation4 + $0x8] sm:$0xff]  ;;  %v581_v58 = vadd.f32 %v1494_v55, %v499_v48  ;;  %v493_v59 = vadd.f32 %v484_v56, %v411_v49  ;;  %v571_v60 = vpop.f32.mrb[5].mxu1  ;;  %v933_v55 = vld [vmem:[#allocation3 + $0x30] sm:$0xff]  ;;  %v1355_v56 = vld [vmem:[%s2099_s6 + $0x2] ss:$0 sm:$0xff] }
  0xf2   :  { %v1258_v61 = vadd.f32 %v1353_v50, %v1222_v57  ;;  %v1112_v62 = vld [vmem:[#allocation2 + $0x18] sm:$0xff]  ;;  %v1221_v63 = vld [vmem:[#allocation4] sm:$0xff]  ;;  %496 = vst.msk [vmem:[#allocation3 + $0x18] sm:$0xff] %vm33_vm0, %v494_v54  ;;  %v580_v0 = vadd.f32 %v571_v60, %v498_v52 }
  0xf3   :  { %v1148_v1 = vadd.f32 %v1346_v53, %v1112_v62  ;;  %v1257_v2 = vadd.f32 %v1353_v50, %v1221_v63  ;;  %v1111_v3 = vld [vmem:[#allocation2 + $0x10] sm:$0xff]  ;;  %583 = vst.msk [vmem:[#allocation4 + $0x18] sm:$0xff] %vm33_vm0, %v581_v58  ;;  %495 = vst.msk [vmem:[#allocation3 + $0x10] sm:$0xff] %vm33_vm0, %v493_v59  ;;  %v1021_v54 = vld [vmem:[#allocation4 + $0x38] sm:$0xff] }
  0xf4   :  { %1266 = vst.msk [vmem:[%s2100_s9 + $0x8] sm:$0xff] %vm33_vm0, %v1258_v61  ;;  %v1147_v4 = vadd.f32 %v1346_v53, %v1111_v3  ;;  %582 = vst.msk [vmem:[#allocation4 + $0x10] sm:$0xff] %vm33_vm0, %v580_v0  ;;  %v934_v53 = vld [vmem:[#allocation3 + $0x38] sm:$0xff]  ;;  %v1020_v58 = vld [vmem:[#allocation4 + $0x30] sm:$0xff] }
  0xf5   :  { %v1156_v5 = vmul.f32 0.35355338, %v1148_v1  ;;  %1265 = vst.msk [vmem:[%s2100_s9] sm:$0xff] %vm33_vm0, %v1257_v2  ;;  %v1348_v59 = vld [vmem:[%s2095_s2 + $0x3] ss:$0 sm:$0xff] }
  0xf6   :  { %v1155_v7 = vmul.f32 0.35355338, %v1147_v4 }
  0xf7   :  { %1164 = vst.msk [vmem:[%s2098_s7 + $0x18] sm:$0xff] %vm33_vm0, %v1156_v5  ;;  %v1505_v11 = vpop.f32.mrb[6].mxu0 }
  0xf8   :  { %1163 = vst.msk [vmem:[%s2098_s7 + $0x10] sm:$0xff] %vm33_vm0, %v1155_v7  ;;  %v668_v15 = vadd.f32 %v1505_v11, %v586_v6  ;;  %v1516_v16 = vpop.f32.mrb[6].mxu1  ;;  %v658_v17 = vpop.f32.mrb[7].mxu0 }
  0xf9   :  { %v1172_v18 = vld [vmem:[#allocation3 + $0x18] sm:$0xff]  ;;  %v755_v19 = vadd.f32 %v1516_v16, %v673_v8  ;;  %v667_v20 = vadd.f32 %v658_v17, %v585_v9  ;;  %v745_v21 = vpop.f32.mrb[7].mxu1 }
  0xfa   :  { %v1208_v22 = vadd.f32 %v1350_v10, %v1172_v18  ;;  %v1224_v12 = vld [vmem:[#allocation4 + $0x18] sm:$0xff]  ;;  %v1171_v23 = vld [vmem:[#allocation3 + $0x10] sm:$0xff]  ;;  %670 = vst.msk [vmem:[#allocation2 + $0x28] sm:$0xff] %vm33_vm0, %v668_v15  ;;  %v754_v24 = vadd.f32 %v745_v21, %v672_v13  ;;  %v1356_v15 = vld [vmem:[%s2099_s6 + $0x3] ss:$0 sm:$0xff] }
  0xfb   :  { %v1260_v25 = vadd.f32 %v1354_v14, %v1224_v12  ;;  %v1207_v26 = vadd.f32 %v1350_v10, %v1171_v23  ;;  %v1223_v27 = vld [vmem:[#allocation4 + $0x10] sm:$0xff]  ;;  %757 = vst.msk [vmem:[#allocation3 + $0x28] sm:$0xff] %vm33_vm0, %v755_v19  ;;  %669 = vst.msk [vmem:[#allocation2 + $0x20] sm:$0xff] %vm33_vm0, %v667_v20 }
  0xfc   :  { %1216 = vst.msk [vmem:[%s2097_s8 + $0x18] sm:$0xff] %vm33_vm0, %v1208_v22  ;;  %v1259_v28 = vadd.f32 %v1354_v14, %v1223_v27  ;;  %756 = vst.msk [vmem:[#allocation3 + $0x20] sm:$0xff] %vm33_vm0, %v754_v24  ;;  %v1352_v14 = vld [vmem:[%s2096_s4 + $0x3] ss:$0 sm:$0xff] }
  0xfd   :  { %1268 = vst.msk [vmem:[%s2100_s9 + $0x18] sm:$0xff] %vm33_vm0, %v1260_v25  ;;  %1215 = vst.msk [vmem:[%s2097_s8 + $0x10] sm:$0xff] %vm33_vm0, %v1207_v26 }
  0xfe   :  { %1267 = vst.msk [vmem:[%s2100_s9 + $0x10] sm:$0xff] %vm33_vm0, %v1259_v28 }
  0xff   :  { %v1527_v33 = vpop.f32.mrb[8].mxu0 }
 0x100   :  { %v842_v36 = vadd.f32 %v1527_v33, %v760_v29  ;;  %v1538_v37 = vpop.f32.mrb[8].mxu1  ;;  %v832_v38 = vpop.f32.mrb[9].mxu0 }
 0x101   :  { %v1114_v39 = vld [vmem:[#allocation2 + $0x28] sm:$0xff]  ;;  %v929_v40 = vadd.f32 %v1538_v37, %v847_v30  ;;  %v841_v41 = vadd.f32 %v832_v38, %v759_v31  ;;  %v919_v42 = vpop.f32.mrb[9].mxu1 }
 0x102   :  { %v1150_v43 = vadd.f32 %v1347_v32, %v1114_v39  ;;  %v1174_v44 = vld [vmem:[#allocation3 + $0x28] sm:$0xff]  ;;  %v1113_v45 = vld [vmem:[#allocation2 + $0x20] sm:$0xff]  ;;  %844 = vst.msk [vmem:[#allocation4 + $0x28] sm:$0xff] %vm33_vm0, %v842_v36  ;;  %v928_v46 = vadd.f32 %v919_v42, %v846_v34 }
 0x103   :  { %v1210_v47 = vadd.f32 %v1351_v35, %v1174_v44  ;;  %v1149_v48 = vadd.f32 %v1347_v32, %v1113_v45  ;;  %v1173_v49 = vld [vmem:[#allocation3 + $0x20] sm:$0xff]  ;;  %931 = vst.msk [vmem:[#allocation2 + $0x38] sm:$0xff] %vm33_vm0, %v929_v40  ;;  %843 = vst.msk [vmem:[#allocation4 + $0x20] sm:$0xff] %vm33_vm0, %v841_v41 }
 0x104   :  { %v1158_v50 = vmul.f32 0.35355338, %v1150_v43  ;;  %v1209_v51 = vadd.f32 %v1351_v35, %v1173_v49  ;;  %930 = vst.msk [vmem:[#allocation2 + $0x30] sm:$0xff] %vm33_vm0, %v928_v46 }
 0x105   :  { %1218 = vst.msk [vmem:[%s2097_s8 + $0x28] sm:$0xff] %vm33_vm0, %v1210_v47  ;;  %v1157_v52 = vmul.f32 0.35355338, %v1149_v48 }
 0x106   :  { %1166 = vst.msk [vmem:[%s2098_s7 + $0x28] sm:$0xff] %vm33_vm0, %v1158_v50  ;;  %1217 = vst.msk [vmem:[%s2097_s8 + $0x20] sm:$0xff] %vm33_vm0, %v1209_v51 }
 0x107   :  { %1165 = vst.msk [vmem:[%s2098_s7 + $0x20] sm:$0xff] %vm33_vm0, %v1157_v52  ;;  %v1549_v57 = vpop.f32.mrb[10].mxu0 }
 0x108   :  { %v1016_v60 = vadd.f32 %v1549_v57, %v934_v53  ;;  %v1560_v61 = vpop.f32.mrb[10].mxu1  ;;  %v1006_v62 = vpop.f32.mrb[11].mxu0 }
 0x109   :  { %v1226_v63 = vld [vmem:[#allocation4 + $0x28] sm:$0xff]  ;;  %v1103_v0 = vadd.f32 %v1560_v61, %v1021_v54  ;;  %v1015_v1 = vadd.f32 %v1006_v62, %v933_v55  ;;  %v1093_v2 = vpop.f32.mrb[11].mxu1 }
 0x10a   :  { %v1262_v3 = vadd.f32 %v1355_v56, %v1226_v63  ;;  %v1116_v4 = vld [vmem:[#allocation2 + $0x38] sm:$0xff]  ;;  %v1225_v5 = vld [vmem:[#allocation4 + $0x20] sm:$0xff]  ;;  %1018 = vst.msk [vmem:[#allocation3 + $0x38] sm:$0xff] %vm33_vm0, %v1016_v60  ;;  %v1102_v6 = vadd.f32 %v1093_v2, %v1020_v58 }
 0x10b   :  { %v1152_v7 = vadd.f32 %v1348_v59, %v1116_v4  ;;  %v1261_v8 = vadd.f32 %v1355_v56, %v1225_v5  ;;  %v1115_v9 = vld [vmem:[#allocation2 + $0x30] sm:$0xff]  ;;  %1105 = vst.msk [vmem:[#allocation4 + $0x38] sm:$0xff] %vm33_vm0, %v1103_v0  ;;  %1017 = vst.msk [vmem:[#allocation3 + $0x30] sm:$0xff] %vm33_vm0, %v1015_v1 }
 0x10c   :  { %1270 = vst.msk [vmem:[%s2100_s9 + $0x28] sm:$0xff] %vm33_vm0, %v1262_v3  ;;  %v1151_v10 = vadd.f32 %v1348_v59, %v1115_v9  ;;  %1104 = vst.msk [vmem:[#allocation4 + $0x30] sm:$0xff] %vm33_vm0, %v1102_v6 }
 0x10d   :  { %v1160_v11 = vmul.f32 0.35355338, %v1152_v7  ;;  %1269 = vst.msk [vmem:[%s2100_s9 + $0x20] sm:$0xff] %vm33_vm0, %v1261_v8 }
 0x10e   :  { %v1159_v13 = vmul.f32 0.35355338, %v1151_v10 }
 0x10f   :  { %1168 = vst.msk [vmem:[%s2098_s7 + $0x38] sm:$0xff] %vm33_vm0, %v1160_v11 }
 0x110   :  { %1167 = vst.msk [vmem:[%s2098_s7 + $0x30] sm:$0xff] %vm33_vm0, %v1159_v13 }
 0x111   :  { %v1176_v16 = vld [vmem:[#allocation3 + $0x38] sm:$0xff] }
 0x112   :  { %v1212_v17 = vadd.f32 %v1352_v14, %v1176_v16  ;;  %v1228_v18 = vld [vmem:[#allocation4 + $0x38] sm:$0xff]  ;;  %v1175_v19 = vld [vmem:[#allocation3 + $0x30] sm:$0xff] }
 0x113   :  { %v1264_v20 = vadd.f32 %v1356_v15, %v1228_v18  ;;  %v1211_v21 = vadd.f32 %v1352_v14, %v1175_v19  ;;  %v1227_v22 = vld [vmem:[#allocation4 + $0x30] sm:$0xff] }
 0x114   :  { %1220 = vst.msk [vmem:[%s2097_s8 + $0x38] sm:$0xff] %vm33_vm0, %v1212_v17  ;;  %v1263_v12 = vadd.f32 %v1356_v15, %v1227_v22 }
 0x115   :  { %1272 = vst.msk [vmem:[%s2100_s9 + $0x38] sm:$0xff] %vm33_vm0, %v1264_v20  ;;  %1219 = vst.msk [vmem:[%s2097_s8 + $0x30] sm:$0xff] %vm33_vm0, %v1211_v21 }
 0x116   :  { %1271 = vst.msk [vmem:[%s2100_s9 + $0x30] sm:$0xff] %vm33_vm0, %v1263_v12 }

</bundles_post_ra>
